<compile_context>
chip_gen: v5e
topology: v5e:2x2
jax: 0.10.0
libtpu: 0.0.40
codegen_flags: <defaults>
</compile_context>

<pallas_src>
import functools

import jax
import jax.numpy as jnp
from jax import lax
from jax.experimental import pallas as pl
from jax.experimental.pallas import tpu as pltpu


def _pow_static(x, p):
    """jnp.power specialized for compile-time exponents (avoids EUP log+exp)."""
    p = float(p)
    if p == 0.0:
        return jnp.ones_like(x)
    if p == 0.5:
        return jnp.sqrt(x)
    if p == 1.0:
        return x
    if p == 2.0:
        return x * x
    if p == 3.0:
        return x * x * x
    return jnp.power(x, p)


def _sfl_kernel(logits_ref, targets_ref, weights_ref, loss_ref,
                clp_acc, fl_acc, w_acc, *,
                gamma, beta, label_smoothing, T, Tt, V):
    # logits_ref:  (Bb, Tt, V) native dtype   targets_ref: (Bb, Tt, 1) i32
    # weights_ref: (Bb, Tt, 1) f32            loss_ref:    (Bb, 1, 1) f32
    # clp_acc / fl_acc / w_acc: (Bb, 1) f32 VMEM scratch (carried over t)
    t = pl.program_id(1)
    num_t = pl.num_programs(1)

    @pl.when(t == 0)
    def _():
        clp_acc[...] = jnp.zeros_like(clp_acc)
        fl_acc[...] = jnp.zeros_like(fl_acc)
        w_acc[...] = jnp.zeros_like(w_acc)

    # Cast inside the kernel: HBM traffic stays at the native (e.g. bf16) width.
    logits = logits_ref[...].astype(jnp.float32)       # (Bb, Tt, V)
    tgt = targets_ref[...]                              # (Bb, Tt, 1) int32
    w = weights_ref[...].astype(jnp.float32)            # (Bb, Tt, 1)

    # Shifted logits / softmax denominator (log_probs is never materialized).
    m = jnp.max(logits, axis=-1, keepdims=True)
    shifted = logits - m                                 # (Bb, Tt, V)
    ex = jnp.exp(shifted)                                # (Bb, Tt, V)
    denom = jnp.sum(ex, axis=-1, keepdims=True)          # (Bb, Tt, 1)
    log_denom = jnp.log(denom)                           # (Bb, Tt, 1)

    # Target-class shifted logit via one-hot select (no gather needed on TPU).
    class_ids = lax.broadcasted_iota(jnp.int32, shifted.shape, 2)
    is_tgt = class_ids == tgt
    shifted_t = jnp.sum(jnp.where(is_tgt, shifted, 0.0),
                        axis=-1, keepdims=True)          # (Bb, Tt, 1)
    logp_t = shifted_t - log_denom                       # (Bb, Tt, 1)
    p_t = jnp.exp(logp_t)                                # probs[target]

    # Guard against p_t rounding to slightly > 1 (NaN with fractional gamma).
    one_minus_pt = jnp.maximum(1.0 - p_t, 0.0)
    fl_tgt = -_pow_static(one_minus_pt, gamma) * logp_t  # (Bb, Tt, 1)

    if label_smoothing > 0.0:
        # smoothed = (1-ls)*onehot + ls/V  =>
        # fl = (1-ls)*fl_tgt + (ls/V) * sum_v -(1-p_v)^gamma * log p_v
        # with sum_v -(1-p_v)^g * log p_v
        #        = -sum(pow * shifted) + log(denom) * sum(pow)
        probs = ex * pl.reciprocal(denom, approx=True)
        powered = _pow_static(jnp.maximum(1.0 - probs, 0.0), gamma)
        sum_pow = jnp.sum(powered, axis=-1, keepdims=True)
        sum_pow_sh = jnp.sum(powered * shifted, axis=-1, keepdims=True)
        full = log_denom * sum_pow - sum_pow_sh
        fl = (1.0 - label_smoothing) * fl_tgt + (label_smoothing / V) * full
    else:
        fl = fl_tgt

    fl_w = fl * w
    clp_w = logp_t * w

    def _accumulate(fl_w_, clp_w_, w_):
        clp_acc[...] += jnp.sum(clp_w_, axis=1)          # (Bb, 1)
        fl_acc[...] += jnp.sum(fl_w_, axis=1)
        w_acc[...] += jnp.sum(w_, axis=1)

    if T % Tt != 0:
        # Only the final T-tile is ragged: only it pays for the masking.
        # Select (not multiply) so garbage rows can't propagate inf/NaN.
        @pl.when(t == num_t - 1)
        def _():
            row = t * Tt + lax.broadcasted_iota(jnp.int32, w.shape, 1)
            valid = row < T
            _accumulate(jnp.where(valid, fl_w, 0.0),
                        jnp.where(valid, clp_w, 0.0),
                        jnp.where(valid, w, 0.0))

        @pl.when(t != num_t - 1)
        def _():
            _accumulate(fl_w, clp_w, w)
    else:
        _accumulate(fl_w, clp_w, w)

    @pl.when(t == num_t - 1)
    def _():
        alpha = _pow_static(1.0 - jnp.exp(clp_acc[...]), beta)   # (Bb, 1)
        loss = alpha * fl_acc[...] / (w_acc[...] + 1e-13)
        loss_ref[...] = loss[:, :, None]


def _vmem_capacity_bytes():
    try:
        return int(pltpu.get_tpu_info().vmem_capacity_bytes)
    except Exception:
        return 64 * 1024 * 1024   # conservative fallback (v7x per-TC VMEM)


def _choose_tiles(B, T, V, logits_dtype, label_smoothing, block_b, block_t):
    """Generation-aware tile selection.

    Models the per-grid-step footprint as:
      rows * V * (2 * native_bytes      # double-buffered logits input
                  + 4 * n_live_f32)     # live f32 V-wide temporaries
    with n_live ~ 4 for the hard-target branch and ~6 for label smoothing,
    where rows = block_b * Tt.
    """
    vmem_cap = _vmem_capacity_bytes()
    # ~half of physical VMEM: 64 MiB on v5e/v6e (128 MiB), 32 MiB on v7x (64 MiB).
    vmem_limit = min(vmem_cap // 2, 64 * 1024 * 1024)
    budget = (vmem_limit * 3) // 4

    n_live = 6 if label_smoothing > 0.0 else 4
    native_bytes = jnp.dtype(logits_dtype).itemsize
    per_row = max(V * (2 * native_bytes + 4 * n_live), 1)
    max_rows = max(8, budget // per_row)

    if block_b is None:
        block_b = 1
        # When the whole sequence fits in one tile, batch rows to amortize the
        # per-grid-step overhead -- but keep >= 2 batch blocks (v7x megacore).
        if (block_t is None or int(block_t) >= T) and max_rows >= T:
            for cand in (8, 4, 2):
                if B % cand == 0 and (B // cand) >= min(2, B) and cand * T <= max_rows:
                    block_b = cand
                    break
    assert B % block_b == 0, "block_b must divide the batch dimension"

    if block_t is not None:
        Tt = int(block_t)
    else:
        rows_per_b = max(max_rows // block_b, 8)
        if rows_per_b >= T:
            Tt = T
        else:
            Tt = min(max(8, (rows_per_b // 8) * 8), T)   # multiple of 8 sublanes

    return block_b, Tt, int(vmem_limit)


def sequence_focal_loss(logits, targets, weights, *, gamma=0.2, beta=2.0,
                        label_smoothing=-1.0, reduce=True,
                        block_b=None, block_t=None):
    """Pallas TPU implementation of SequenceFocalLoss.forward."""
    B, T, V = logits.shape
    block_b, Tt, vmem_limit = _choose_tiles(
        B, T, V, logits.dtype, float(label_smoothing), block_b, block_t)

    # Only the tiny (B, T) side inputs are reshaped/cast in the wrapper;
    # the big logits tensor is passed through in its native dtype.
    targets3 = targets.astype(jnp.int32).reshape(B, T, 1)
    weights3 = weights.astype(jnp.float32).reshape(B, T, 1)

    kernel = functools.partial(
        _sfl_kernel, gamma=float(gamma), beta=float(beta),
        label_smoothing=float(label_smoothing), T=T, Tt=Tt, V=V)

    grid = (B // block_b, pl.cdiv(T, Tt))

    per_batch = pl.pallas_call(
        kernel,
        out_shape=jax.ShapeDtypeStruct((B, 1, 1), jnp.float32),
        grid_spec=pltpu.PrefetchScalarGridSpec(
            num_scalar_prefetch=0,
            grid=grid,
            in_specs=[
                pl.BlockSpec((block_b, Tt, V), lambda b, t: (b, t, 0)),
                pl.BlockSpec((block_b, Tt, 1), lambda b, t: (b, t, 0)),
                pl.BlockSpec((block_b, Tt, 1), lambda b, t: (b, t, 0)),
            ],
            out_specs=pl.BlockSpec((block_b, 1, 1), lambda b, t: (b, 0, 0)),
            scratch_shapes=[
                pltpu.VMEM((block_b, 1), jnp.float32),   # clp_sum accumulator
                pltpu.VMEM((block_b, 1), jnp.float32),   # fl_sum accumulator
                pltpu.VMEM((block_b, 1), jnp.float32),   # w_sum accumulator
            ],
        ),
        compiler_params=pltpu.CompilerParams(
            dimension_semantics=("parallel", "arbitrary"),
            vmem_limit_bytes=vmem_limit,
        ),
    )(logits, targets3, weights3)

    loss = per_batch.reshape(B)
    if reduce:
        loss = jnp.mean(loss)
    return loss


def _reference(logits, targets, weights, gamma=0.2, beta=2.0,
               label_smoothing=-1.0, reduce=True):
    """Pure-JAX reference mirroring the PyTorch code (for verification)."""
    B, T, V = logits.shape
    lf = logits.reshape(-1, V).astype(jnp.float32)
    probs = jax.nn.softmax(lf, axis=-1)
    log_probs = jax.nn.log_softmax(lf, axis=-1)
    tf = targets.reshape(-1).astype(jnp.int32)
    if label_smoothing > 0.0:
        one_hot = jax.nn.one_hot(tf, V, dtype=jnp.float32) * (1.0 - label_smoothing)
        smoothed = one_hot + label_smoothing / V
        fl = jnp.sum(-jnp.power(1.0 - probs, gamma) * log_probs * smoothed, axis=-1)
    else:
        p_t = jnp.take_along_axis(probs, tf[:, None], axis=1)[:, 0]
        fl = -jnp.power(1.0 - p_t, gamma) * jnp.log(p_t)
    clp = jnp.take_along_axis(log_probs, tf[:, None], axis=1)[:, 0].reshape(B, T)
    clp = clp * weights
    alpha = jnp.power(1.0 - jnp.exp(clp.sum(-1)), beta)
    fl = fl.reshape(B, T) * weights.astype(jnp.float32)
    loss = alpha * fl.sum(1) / (weights.sum(1) + 1e-13)
    if reduce:
        loss = loss.mean()
    return loss


if __name__ == "__main__":
    key = jax.random.PRNGKey(0)
    B, T, V = 2, 8, 32
    k1, k2, k3 = jax.random.split(key, 3)
    logits = jax.random.normal(k1, (B, T, V), dtype=jnp.float32)
    targets = jax.random.randint(k2, (B, T), 0, V, dtype=jnp.int32)
    weights = (jax.random.uniform(k3, (B, T)) > 0.3).astype(jnp.float32)

    # hard-target branch
    loss = sequence_focal_loss(logits, targets, weights)
    jax.block_until_ready(loss)
    ref = _reference(logits, targets, weights)
    assert jnp.allclose(loss, ref, atol=1e-4, rtol=1e-4), (loss, ref)

    # label-smoothing branch
    loss_ls = sequence_focal_loss(logits, targets, weights, label_smoothing=0.1)
    jax.block_until_ready(loss_ls)
    ref_ls = _reference(logits, targets, weights, label_smoothing=0.1)
    assert jnp.allclose(loss_ls, ref_ls, atol=1e-4, rtol=1e-4), (loss_ls, ref_ls)

    # T-tiled path with a ragged tail (T=24, Tt=16) + bf16 logits cast in-kernel
    B2, T2, V2 = 2, 24, 256
    l2 = jax.random.normal(k1, (B2, T2, V2), dtype=jnp.float32).astype(jnp.bfloat16)
    t2 = jax.random.randint(k2, (B2, T2), 0, V2, dtype=jnp.int32)
    w2 = (jax.random.uniform(k3, (B2, T2)) > 0.3).astype(jnp.float32)
    loss2 = sequence_focal_loss(l2, t2, w2, block_t=16)
    jax.block_until_ready(loss2)
    ref2 = _reference(l2.astype(jnp.float32), t2, w2)
    assert jnp.allclose(loss2, ref2, atol=1e-3, rtol=1e-3), (loss2, ref2)

    # ragged tail in the smoothing branch as well
    loss3 = sequence_focal_loss(l2, t2, w2, block_t=16, label_smoothing=0.1)
    jax.block_until_ready(loss3)
    ref3 = _reference(l2.astype(jnp.float32), t2, w2, label_smoothing=0.1)
    assert jnp.allclose(loss3, ref3, atol=1e-3, rtol=1e-3), (loss3, ref3)

    print("KERNEL_OK")
</pallas_src>

<mosaic_0001>
module attributes {stable_mosaic.version = 11 : i64} {
  func.func @_sfl_kernel(%arg0: i32, %arg1: i32, %arg2: memref<1x8x32xf32, #tpu.memory_space<vmem>>, %arg3: memref<1x8x1xi32, #tpu.memory_space<vmem>>, %arg4: memref<1x8x1xf32, #tpu.memory_space<vmem>>, %arg5: memref<1x1x1xf32, #tpu.memory_space<vmem>>, %arg6: memref<1x1xf32, #tpu.memory_space<vmem>>, %arg7: memref<1x1xf32, #tpu.memory_space<vmem>>, %arg8: memref<1x1xf32, #tpu.memory_space<vmem>>) attributes {dimension_semantics = [#tpu.dimension_semantics<parallel>, #tpu.dimension_semantics<arbitrary>], iteration_bounds = array<i64: 2, 1>, scalar_prefetch = 0 : i64, scratch_operands = 3 : i64, tpu.core_type = #tpu.core_type<tc>, window_params = [{transform_indices = @transform_0, window_bounds = array<i64: 1, 8, 32>}, {transform_indices = @transform_1, window_bounds = array<i64: 1, 8, 1>}, {transform_indices = @transform_2, window_bounds = array<i64: 1, 8, 1>}, {transform_indices = @transform_3, window_bounds = array<i64: 1, 1, 1>}]} {
    %c0_i32 = arith.constant 0 : i32
    %0 = arith.cmpi eq, %arg1, %c0_i32 : i32
    %1 = arith.extui %0 : i1 to i32
    %c0_i32_0 = arith.constant 0 : i32
    %2 = arith.cmpi ne, %1, %c0_i32_0 : i32
    scf.if %2 {
      %cst_33 = arith.constant 0.000000e+00 : f32
      %49 = vector.broadcast %cst_33 : f32 to vector<1x1xf32>
      %c0_34 = arith.constant 0 : index
      %c0_35 = arith.constant 0 : index
      %50 = vector.load %arg6[%c0_34, %c0_35] : memref<1x1xf32, #tpu.memory_space<vmem>>, vector<1x1xf32>
      tpu.vector_store %arg6[%c0_34, %c0_35], %49 {strides = array<i32>} : memref<1x1xf32, #tpu.memory_space<vmem>>, vector<1x1xf32>,
      %cst_36 = arith.constant 0.000000e+00 : f32
      %51 = vector.broadcast %cst_36 : f32 to vector<1x1xf32>
      %c0_37 = arith.constant 0 : index
      %c0_38 = arith.constant 0 : index
      %52 = vector.load %arg7[%c0_37, %c0_38] : memref<1x1xf32, #tpu.memory_space<vmem>>, vector<1x1xf32>
      tpu.vector_store %arg7[%c0_37, %c0_38], %51 {strides = array<i32>} : memref<1x1xf32, #tpu.memory_space<vmem>>, vector<1x1xf32>,
      %cst_39 = arith.constant 0.000000e+00 : f32
      %53 = vector.broadcast %cst_39 : f32 to vector<1x1xf32>
      %c0_40 = arith.constant 0 : index
      %c0_41 = arith.constant 0 : index
      %54 = vector.load %arg8[%c0_40, %c0_41] : memref<1x1xf32, #tpu.memory_space<vmem>>, vector<1x1xf32>
      tpu.vector_store %arg8[%c0_40, %c0_41], %53 {strides = array<i32>} : memref<1x1xf32, #tpu.memory_space<vmem>>, vector<1x1xf32>,
    } else {
    }
    %c0 = arith.constant 0 : index
    %c0_1 = arith.constant 0 : index
    %c0_2 = arith.constant 0 : index
    %3 = vector.load %arg2[%c0, %c0_1, %c0_2] : memref<1x8x32xf32, #tpu.memory_space<vmem>>, vector<1x8x32xf32>
    %c0_3 = arith.constant 0 : index
    %c0_4 = arith.constant 0 : index
    %c0_5 = arith.constant 0 : index
    %4 = vector.load %arg3[%c0_3, %c0_4, %c0_5] : memref<1x8x1xi32, #tpu.memory_space<vmem>>, vector<1x8x1xi32>
    %c0_6 = arith.constant 0 : index
    %c0_7 = arith.constant 0 : index
    %c0_8 = arith.constant 0 : index
    %5 = vector.load %arg4[%c0_6, %c0_7, %c0_8] : memref<1x8x1xf32, #tpu.memory_space<vmem>>, vector<1x8x1xf32>
    %cst = arith.constant dense<0xFF800000> : vector<1x8xf32>
    %6 = vector.multi_reduction <maximumf>, %3, %cst [2] : vector<1x8x32xf32> to vector<1x8xf32>
    %7 = vector.shape_cast %6 : vector<1x8xf32> to vector<1x8x1xf32>
    %8 = vector.broadcast %7 : vector<1x8x1xf32> to vector<1x8x32xf32>
    %9 = arith.subf %3, %8 : vector<1x8x32xf32>
    %10 = math.exp %9 : vector<1x8x32xf32>
    %cst_9 = arith.constant dense<0.000000e+00> : vector<1x8xf32>
    %11 = vector.multi_reduction <add>, %10, %cst_9 [2] : vector<1x8x32xf32> to vector<1x8xf32>
    %12 = vector.shape_cast %11 : vector<1x8xf32> to vector<1x8x1xf32>
    %13 = math.log %12 : vector<1x8x1xf32>
    %14 = tpu.iota {dimensions = array<i32: 2>} : vector<1x8x32xi32>
    %15 = vector.broadcast %4 : vector<1x8x1xi32> to vector<1x8x32xi32>
    %16 = arith.cmpi eq, %14, %15 : vector<1x8x32xi32>
    %cst_10 = arith.constant 0.000000e+00 : f32
    %17 = vector.broadcast %cst_10 : f32 to vector<1x8x32xf32>
    %18 = arith.select %16, %9, %17 : vector<1x8x32xi1>, vector<1x8x32xf32>
    %cst_11 = arith.constant dense<0.000000e+00> : vector<1x8xf32>
    %19 = vector.multi_reduction <add>, %18, %cst_11 [2] : vector<1x8x32xf32> to vector<1x8xf32>
    %20 = vector.shape_cast %19 : vector<1x8xf32> to vector<1x8x1xf32>
    %21 = arith.subf %20, %13 : vector<1x8x1xf32>
    %22 = math.exp %21 : vector<1x8x1xf32>
    %cst_12 = arith.constant 1.000000e+00 : f32
    %23 = vector.broadcast %cst_12 : f32 to vector<1x8x1xf32>
    %24 = arith.subf %23, %22 : vector<1x8x1xf32>
    %cst_13 = arith.constant 0.000000e+00 : f32
    %25 = vector.broadcast %cst_13 : f32 to vector<1x8x1xf32>
    %26 = arith.maximumf %24, %25 : vector<1x8x1xf32>
    %cst_14 = arith.constant 2.000000e-01 : f32
    %27 = vector.broadcast %cst_14 : f32 to vector<1x8x1xf32>
    %28 = math.powf %26, %27 : vector<1x8x1xf32>
    %cst_15 = arith.constant 0.000000e+00 : f32
    %29 = vector.broadcast %cst_15 : f32 to vector<1x8x1xf32>
    %30 = arith.subf %29, %28 : vector<1x8x1xf32>
    %31 = arith.mulf %30, %21 : vector<1x8x1xf32>
    %32 = arith.mulf %31, %5 : vector<1x8x1xf32>
    %33 = arith.mulf %21, %5 : vector<1x8x1xf32>
    %c0_16 = arith.constant 0 : index
    %c0_17 = arith.constant 0 : index
    %34 = vector.load %arg6[%c0_16, %c0_17] : memref<1x1xf32, #tpu.memory_space<vmem>>, vector<1x1xf32>
    %cst_18 = arith.constant dense<0.000000e+00> : vector<1x1xf32>
    %35 = vector.multi_reduction <add>, %33, %cst_18 [1] : vector<1x8x1xf32> to vector<1x1xf32>
    %36 = arith.addf %34, %35 : vector<1x1xf32>
    %c0_19 = arith.constant 0 : index
    %c0_20 = arith.constant 0 : index
    %37 = vector.load %arg6[%c0_19, %c0_20] : memref<1x1xf32, #tpu.memory_space<vmem>>, vector<1x1xf32>
    tpu.vector_store %arg6[%c0_19, %c0_20], %36 {strides = array<i32>} : memref<1x1xf32, #tpu.memory_space<vmem>>, vector<1x1xf32>,
    %c0_21 = arith.constant 0 : index
    %c0_22 = arith.constant 0 : index
    %38 = vector.load %arg7[%c0_21, %c0_22] : memref<1x1xf32, #tpu.memory_space<vmem>>, vector<1x1xf32>
    %cst_23 = arith.constant dense<0.000000e+00> : vector<1x1xf32>
    %39 = vector.multi_reduction <add>, %32, %cst_23 [1] : vector<1x8x1xf32> to vector<1x1xf32>
    %40 = arith.addf %38, %39 : vector<1x1xf32>
    %c0_24 = arith.constant 0 : index
    %c0_25 = arith.constant 0 : index
    %41 = vector.load %arg7[%c0_24, %c0_25] : memref<1x1xf32, #tpu.memory_space<vmem>>, vector<1x1xf32>
    tpu.vector_store %arg7[%c0_24, %c0_25], %40 {strides = array<i32>} : memref<1x1xf32, #tpu.memory_space<vmem>>, vector<1x1xf32>,
    %c0_26 = arith.constant 0 : index
    %c0_27 = arith.constant 0 : index
    %42 = vector.load %arg8[%c0_26, %c0_27] : memref<1x1xf32, #tpu.memory_space<vmem>>, vector<1x1xf32>
    %cst_28 = arith.constant dense<0.000000e+00> : vector<1x1xf32>
    %43 = vector.multi_reduction <add>, %5, %cst_28 [1] : vector<1x8x1xf32> to vector<1x1xf32>
    %44 = arith.addf %42, %43 : vector<1x1xf32>
    %c0_29 = arith.constant 0 : index
    %c0_30 = arith.constant 0 : index
    %45 = vector.load %arg8[%c0_29, %c0_30] : memref<1x1xf32, #tpu.memory_space<vmem>>, vector<1x1xf32>
    tpu.vector_store %arg8[%c0_29, %c0_30], %44 {strides = array<i32>} : memref<1x1xf32, #tpu.memory_space<vmem>>, vector<1x1xf32>,
    %c0_i32_31 = arith.constant 0 : i32
    %46 = arith.cmpi eq, %arg1, %c0_i32_31 : i32
    %47 = arith.extui %46 : i1 to i32
    %c0_i32_32 = arith.constant 0 : i32
    %48 = arith.cmpi ne, %47, %c0_i32_32 : i32
    scf.if %48 {
      %c0_33 = arith.constant 0 : index
      %c0_34 = arith.constant 0 : index
      %49 = vector.load %arg6[%c0_33, %c0_34] : memref<1x1xf32, #tpu.memory_space<vmem>>, vector<1x1xf32>
      %50 = math.exp %49 : vector<1x1xf32>
      %cst_35 = arith.constant 1.000000e+00 : f32
      %51 = vector.broadcast %cst_35 : f32 to vector<1x1xf32>
      %52 = arith.subf %51, %50 : vector<1x1xf32>
      %53 = arith.mulf %52, %52 : vector<1x1xf32>
      %c0_36 = arith.constant 0 : index
      %c0_37 = arith.constant 0 : index
      %54 = vector.load %arg7[%c0_36, %c0_37] : memref<1x1xf32, #tpu.memory_space<vmem>>, vector<1x1xf32>
      %55 = arith.mulf %53, %54 : vector<1x1xf32>
      %c0_38 = arith.constant 0 : index
      %c0_39 = arith.constant 0 : index
      %56 = vector.load %arg8[%c0_38, %c0_39] : memref<1x1xf32, #tpu.memory_space<vmem>>, vector<1x1xf32>
      %cst_40 = arith.constant 9.99999982E-14 : f32
      %57 = vector.broadcast %cst_40 : f32 to vector<1x1xf32>
      %58 = arith.addf %56, %57 : vector<1x1xf32>
      %59 = arith.divf %55, %58 : vector<1x1xf32>
      %60 = vector.shape_cast %59 : vector<1x1xf32> to vector<1x1x1xf32>
      %c0_41 = arith.constant 0 : index
      %c0_42 = arith.constant 0 : index
      %c0_43 = arith.constant 0 : index
      %61 = vector.load %arg5[%c0_41, %c0_42, %c0_43] : memref<1x1x1xf32, #tpu.memory_space<vmem>>, vector<1x1x1xf32>
      tpu.vector_store %arg5[%c0_41, %c0_42, %c0_43], %60 {strides = array<i32>} : memref<1x1x1xf32, #tpu.memory_space<vmem>>, vector<1x1x1xf32>,
    } else {
    }
    return
  }
  func.func @transform_0(%arg0: i32, %arg1: i32) -> (i32, i32, i32) {
    %c0_i32 = arith.constant 0 : i32
    %c0_i32_0 = arith.constant 0 : i32
    return %arg0, %arg1, %c0_i32 : i32, i32, i32
  }
  func.func @transform_1(%arg0: i32, %arg1: i32) -> (i32, i32, i32) {
    %c0_i32 = arith.constant 0 : i32
    %c0_i32_0 = arith.constant 0 : i32
    return %arg0, %arg1, %c0_i32 : i32, i32, i32
  }
  func.func @transform_2(%arg0: i32, %arg1: i32) -> (i32, i32, i32) {
    %c0_i32 = arith.constant 0 : i32
    %c0_i32_0 = arith.constant 0 : i32
    return %arg0, %arg1, %c0_i32 : i32, i32, i32
  }
  func.func @transform_3(%arg0: i32, %arg1: i32) -> (i32, i32, i32) {
    %c0_i32 = arith.constant 0 : i32
    %c0_i32_0 = arith.constant 0 : i32
    %c0_i32_1 = arith.constant 0 : i32
    return %arg0, %c0_i32, %c0_i32_0 : i32, i32, i32
  }
}

</mosaic_0001>

<bundles_post_ra>
// kernel: tpu_custom_call.1
= control target key start
LH: loop header
LB: loop body
LE: loop exit
PB: predicated region body
PF: predicated region fallthrough
CT: control target
= control target key end

     0   :  { %s600_s12 = smov 0   ;;  %s602_s13 = smov 0   ;;  %s676_s0 = inlined_call_operand.vmem [shape: f32[2,8,32], index: 0, kind: input, shape index: {}]   ;;  %s677_s1 = inlined_call_operand.vmem [shape: s32[2,8,1], index: 1, kind: input, shape index: {}]   ;;  %s678_s2 = inlined_call_operand.vmem [shape: f32[2,8,1], index: 2, kind: input, shape index: {}]   ;;  %s679_s3 = inlined_call_operand.vmem [shape: f32[2,1,1], index: 3, kind: output, shape index: {}]  }
   0x1   :  { %s604_s14 = smov 0  }
   0x2 LB: > { %s25_s15 = sadd.s32 1, %s572_s13  ;;  %p438_p0 = scmp.ge.s32.totalorder %s576_s14, 1  ;;  %s576_s14 = sphi %s604_s14, %s13_s14   ;;  %s572_s13 = sphi %s602_s13, %s681_s13   ;;  %s568_s12 = sphi %s600_s12, %s680_s12  }
   0x3   : > { %p27_p1 = scmp.ge.s32.totalorder %s25_s15, 2  ;;  %p181_p2 = scmp.lt.s32.totalorder %s576_s14, 3 }
   0x5   : > { %s683_s15 = smov (%p27_p1, %s25_s15), 0  ;;  %p182_p3 = pnand %p438_p0, %p181_p2 }
   0x6   : > { %p219_p4 = scmp.lt.s32.totalorder (!%p182_p3), %s568_s12, 1 }
   0x7   : > { %185 = sbr.rel (%p182_p3) target bundleno = 377 (0x179), region = 32 }
   0xc   : > { %vm247_vm0 = vcmask 0   ;;  %v578_v0 = vmov 0.0   ;;  %s685_s12 = smov (!%p219_p4, %s568_s12), 1  ;;  %v579_v1 = vmov 0   ;;  %vm254_vm1 = vcmask 261120  }
   0xd   : > { %250 = vst.msk [vmem:[#allocation4] sm:$0x1] %vm247_vm0, %v578_v0  ;;  %541 = vset.pattern.permute.xlu0 %v579_v1  ;;  %s439_s16 = sshll.u32 %s685_s12, 3  ;;  %vm287_vm2 = vcmask 7168   ;;  %v266_v20 = vlaneseq  ;;  %s242_s28 = scalar_lea.vmem %s679_s3, %s685_s12 }
   0xe   : > { %248 = vst.msk [vmem:[#allocation2] sm:$0x1] %vm247_vm0, %v578_v0  ;;  %s225_s19 = scalar_lea.vmem %s676_s0, %s439_s16  ;;  %s239_s22 = scalar_lea.vmem %s678_s2, %s439_s16 }
   0xf   : > { %249 = vst.msk [vmem:[#allocation3] sm:$0x1] %vm247_vm0, %v578_v0  ;;  %v251_v2 = vld [vmem:[%s225_s19] sm:$0xff]  ;;  %s232_s25 = scalar_lea.vmem %s677_s1, %s439_s16  ;;  %v267_v21 = vand.u32 127, %v266_v20 }
  0x10   : > { %v630_v3 = vld [vmem:[%s239_s22] sm:$0xff]  ;;  %v255_v4 = vsel %vm254_vm1, %v251_v2, -inf }
  0x11   : > { %v309_v5 = vsel %vm287_vm2, %v630_v3, 0.0  ;;  %256 = vmax.xlane.f32.xlu0 %v255_v4  ;;  %v252_v14 = vld [vmem:[%s232_s25] sm:$0xff] }
  0x12   : > { %v310_v6 = vrot.slane %v309_v5, 4 }
  0x14   : > { %v311_v7 = vadd.f32 %v310_v6, %v309_v5  ;;  %v308_v11 = vld [vmem:[#allocation4] sm:$0x1] }
  0x15   : > { %v286_v41 = vld [vmem:[#allocation2] sm:$0x1] }
  0x16   : > { %v312_v8 = vrot.slane %v311_v7, 2 }
  0x18   : > { %v313_v9 = vadd.f32 %v312_v8, %v311_v7 }
  0x1a   : > { %v314_v10 = vrot.slane %v313_v9, 1 }
  0x1c   : > { %v315_v12 = vadd.f32 %v314_v10, %v313_v9 }
  0x1e   : > { %v316_v13 = vadd.f32 %v315_v12, %v308_v11 }
  0x20   : > { %317 = vst.msk [vmem:[#allocation4] sm:$0x1] %vm247_vm0, %v316_v13 }
  0x25   : > { %269 = vperm.xlu0 %541, %v252_v14  }
  0x84   : > { %v257_v15 = vpop.xlane.xlu0 %256 }
  0x85   : > { %v258_v16 = vsub.f32 %v251_v2, %v257_v15 }
  0x87   : > { %v259_v17 = vmul.f32 1.442695, %v258_v16 }
  0x89   : > { %542 = vpow2.f32 %v259_v17 }
  0x8f   : > { %v543_v18 = vpop.eup %542 }
  0x90   : > { %v261_v19 = vsel %vm254_vm1, %v543_v18, 0.0 }
  0x91   : > { %262 = vadd.xlane.f32.xlu1 %v261_v19  ;;  %v328_v19 = vld [vmem:[#allocation4] sm:$0x1] }
  0x97   : > { %v270_v22 = vpop.permute.xlu0 %269 }
  0x98   : > { %vm271_vm3 = vcmp.eq.s32.totalorder %v267_v21, %v270_v22  ;;  %v329_v22 = vadd.f32 1e-13, %v328_v19 }
  0x99   : > { %v272_v23 = vsel %vm271_vm3, %v258_v16, 0.0 }
  0x9a   : > { %v273_v24 = vsel %vm254_vm1, %v272_v23, 0.0  ;;  %vm335_vm14 = vweird.f32 %v329_v22 }
  0x9b   : > { %274 = vadd.xlane.f32.xlu1 %v273_v24 }
 0x104   : > { %v263_v25 = vpop.xlane.xlu1 %262 }
 0x105   : > { %544 = vlog2.f32 %v263_v25 }
 0x10b   : > { %v545_v26 = vpop.eup %544 }
 0x10c   : > { %v265_v27 = vmul.f32 0.6931472, %v545_v26 }
 0x10e   : > { %v275_v28 = vpop.xlane.xlu1 %274 }
 0x10f   : > { %v641_v29 = vsub.f32 %v275_v28, %v265_v27 }
 0x111   : > { %v277_v30 = vmul.f32 1.442695, %v641_v29  ;;  %v285_v31 = vmul.f32 %v641_v29, %v630_v3 }
 0x113   : > { %546 = vpow2.f32 %v277_v30  ;;  %v288_v32 = vsel %vm287_vm2, %v285_v31, 0.0 }
 0x114   : > { %v289_v33 = vrot.slane %v288_v32, 4 }
 0x116   : > { %v290_v34 = vadd.f32 %v289_v33, %v288_v32 }
 0x118   : > { %v291_v35 = vrot.slane %v290_v34, 2 }
 0x119   : > { %v547_v36 = vpop.eup %546 }
 0x11a   : > { %v279_v37 = vsub.f32 1.0, %v547_v36  ;;  %v292_v38 = vadd.f32 %v291_v35, %v290_v34 }
 0x11c   : > { %v647_v39 = vmax.f32 %v279_v37, 0.0  ;;  %v293_v40 = vrot.slane %v292_v38, 1 }
 0x11e   : > { %v448_v42 = vand.u32 2147483647, %v647_v39  ;;  %v294_v43 = vadd.f32 %v293_v40, %v292_v38  ;;  %vm495_vm9 = vcmp.lt.f32.partialorder %v647_v39, 0  ;;  %vm496_vm10 = vcmp.eq.f32.partialorder %v647_v39, 0 }
 0x11f   : > { %vm508_vm12 = vcmp.ne.f32.partialorder %v647_v39, %v647_v39  ;;  %vm497_vm13 = vcmp.eq.f32.partialorder %v647_v39, 1065353216 }
 0x120   : > { %v454_v44 = vand.u32 8388607, %v448_v42  ;;  %v295_v45 = vadd.f32 %v294_v43, %v286_v41  ;;  %v450_v53 = vand.u32 2139095040, %v448_v42  ;;  %vm488_vm5 = vweird.f32 %v448_v42 }
 0x121   : > { %vm487_vm6 = vcmp.lt.f32.partialorder %v448_v42, 0.0  ;;  %vm486_vm7 = vcmp.eq.f32.partialorder %v448_v42, 0.0  ;;  %vm485_vm8 = vcmp.eq.f32.partialorder %v448_v42, 1.0  ;;  %vm500_vm11 = vcmp.eq.f32.partialorder %v448_v42, 2139095040 }
 0x122   : > { %v455_v46 = vor.u32 8388608, %v454_v44  ;;  %297 = vst.msk [vmem:[#allocation2] sm:$0x1] %vm247_vm0, %v295_v45  ;;  %v451_v58 = vshrl.u32 %v450_v53, 23  ;;  %v341_v45 = vand.u32 2147483648, %v329_v22 }
 0x124   : > { %v457_v47 = vand.u32 8388607, %v455_v46  ;;  %v513_v63 = vadd.s32 4294967169, %v451_v58 }
 0x126   : > { %v458_v48 = vor.u32 1065353216, %v457_v47  ;;  %v462_v5 = vadd.s32 1, %v513_v63  ;;  %v339_v47 = vand.u32 2147483647, %v329_v22 }
 0x128   : > { %vm459_vm4 = vcmp.ge.f32.partialorder %v458_v48, 1.4142135  ;;  %v460_v49 = vmul.f32 0.5, %v458_v48 }
 0x129   : > { %v463_v9 = vsel %vm459_vm4, %v462_v5, %v513_v63  ;;  %v321_v34 = vld [vmem:[#allocation2] sm:$0x1] }
 0x12a   : > { %v461_v50 = vsel %vm459_vm4, %v460_v49, %v458_v48  ;;  %v483_v12 = vcvt.s32.f32 %v463_v9  ;;  %v322_v37 = vmul.f32 1.442695, %v321_v34  ;;  %v342_v49 = vor.u32 1.1754944e-38, %v341_v45 }
 0x12b   : > { %v514_v51 = vadd.f32 -1.0, %v461_v50 }
 0x12d   : > { %v465_v52 = vmul.f32 %v514_v51, %v514_v51 }
 0x12f   : > { %v466_v54 = vmul.f32 0.12621109, %v465_v52  ;;  %v468_v55 = vmul.f32 -0.20706727, %v465_v52 }
 0x131   : > { %v467_v56 = vadd.f32 0.21545328, %v466_v54  ;;  %v469_v57 = vadd.f32 -0.23896284, %v468_v55 }
 0x133   : > { %v470_v59 = vmul.f32 %v467_v56, %v465_v52  ;;  %v472_v60 = vmul.f32 %v469_v57, %v465_v52 }
 0x135   : > { %v471_v61 = vadd.f32 0.28795174, %v470_v59  ;;  %v473_v62 = vadd.f32 -0.3607037, %v472_v60 }
 0x137   : > { %v474_v0 = vmul.f32 %v471_v61, %v465_v52  ;;  %v476_v1 = vmul.f32 %v473_v62, %v465_v52 }
 0x139   : > { %v475_v2 = vadd.f32 0.48090908, %v474_v0  ;;  %v477_v4 = vadd.f32 -0.72134733, %v476_v1 }
 0x13b   : > { %v478_v6 = vmul.f32 %v475_v2, %v465_v52  ;;  %v480_v8 = vmul.f32 %v514_v51, %v477_v4 }
 0x13d   : > { %v479_v7 = vadd.f32 1.442695, %v478_v6 }
 0x13f   : > { %v481_v10 = vadd.f32 %v480_v8, %v479_v7 }
 0x141   : > { %v482_v11 = vmul.f32 %v514_v51, %v481_v10 }
 0x143   : > { %v484_v13 = vadd.f32 %v483_v12, %v482_v11 }
 0x145   : > { %v489_v14 = vsel %vm488_vm5, %v448_v42, %v484_v13  ;;  %v298_v42 = vld [vmem:[#allocation3] sm:$0x1] }
 0x146   : > { %v490_v15 = vsel %vm487_vm6, nan, %v489_v14 }
 0x147   : > { %v491_v16 = vsel %vm486_vm7, -inf, %v490_v15 }
 0x148   : > { %v492_v17 = vsel %vm485_vm8, 0.0, %v491_v16 }
 0x149   : > { %v493_v18 = vmul.f32 0.2, %v492_v17 }
 0x14b   : > { %548 = vpow2.f32 %v493_v18 }
 0x14c   : > { %550 = vrcp.f32 %v329_v22 }
 0x14d   : > { %552 = vpow2.f32 %v322_v37 }
 0x151   : > { %v549_v20 = vpop.eup %548 }
 0x152   : > { %v501_v21 = vsel %vm495_vm9, 2143289344, %v549_v20  ;;  %v551_v31 = vpop.eup %550 }
 0x153   : > { %v502_v23 = vsel %vm496_vm10, 0, %v501_v21  ;;  %v331_v35 = vmul.f32 %v551_v31, %v329_v22  ;;  %vm336_vm15 = vweird.f32 %v551_v31 }
 0x154   : > { %v507_v24 = vsel %vm500_vm11, 2139095040, %v502_v23  ;;  %vm337_vm1 = vmor %vm335_vm14, %vm336_vm15 }
 0x155   : > { %v511_v25 = vsel %vm508_vm12, 2143289344, %v507_v24  ;;  %v332_v40 = vsub.f32 1.0, %v331_v35 }
 0x156   : > { %v512_v26 = vsel %vm497_vm13, 1065353216, %v511_v25 }
 0x157   : > { %v282_v27 = vsub.f32 0.0, %v512_v26  ;;  %v333_v43 = vmul.f32 %v551_v31, %v332_v40 }
 0x159   : > { %v283_v28 = vmul.f32 %v282_v27, %v641_v29  ;;  %v553_v29 = vpop.eup %552  ;;  %v334_v46 = vadd.f32 %v551_v31, %v333_v43 }
 0x15a   : > { %v324_v48 = vsub.f32 1.0, %v553_v29 }
 0x15b   : > { %v284_v30 = vmul.f32 %v283_v28, %v630_v3  ;;  %v338_v50 = vsel %vm337_vm1, %v551_v31, %v334_v46 }
 0x15c   : > { %v325_v51 = vmul.f32 %v324_v48, %v324_v48 }
 0x15d   : > { %v299_v32 = vsel %vm287_vm2, %v284_v30, 0.0  ;;  %vm340_vm2 = vcmp.eq.f32.partialorder %v339_v47, 8.507059e+37 }
 0x15e   : > { %v300_v33 = vrot.slane %v299_v32, 4  ;;  %v343_v52 = vsel %vm340_vm2, %v342_v49, %v338_v50 }
 0x160   : > { %v301_v36 = vadd.f32 %v300_v33, %v299_v32 }
 0x162   : > { %v302_v38 = vrot.slane %v301_v36, 2 }
 0x164   : > { %v303_v41 = vadd.f32 %v302_v38, %v301_v36 }
 0x166   : > { %v304_v39 = vrot.slane %v303_v41, 1 }
 0x168   : > { %v305_v44 = vadd.f32 %v304_v39, %v303_v41 }
 0x16a   : > { %v306_v3 = vadd.f32 %v305_v44, %v298_v42 }
 0x16c   : > { %307 = vst.msk [vmem:[#allocation3] sm:$0x1] %vm247_vm0, %v306_v3 }
 0x173   : > { %v326_v53 = vld [vmem:[#allocation3] sm:$0x1] }
 0x174   : > { %v327_v54 = vmul.f32 %v326_v53, %v325_v51 }
 0x176   : > { %v344_v55 = vmul.f32 %v343_v52, %v327_v54 }
 0x178   : > { %345 = vst.msk [vmem:[%s242_s28] sm:$0x1] %vm247_vm0, %v344_v55 }
 0x179 PF: > { %s13_s14 = sadd.s32 1, %s576_s14   ;;  %s680_s12 = smov %s572_s13 }
 0x17a   : > { %p10_p5 = scmp.ge.s32.totalorder %s13_s14, 4   ;;  %s681_s13 = smov %s683_s15 }
 0x17c   :  { %12 = sbr.rel (!%p10_p5) target bundleno = 2 (0x2), region = 76 }

</bundles_post_ra>
